<compile_context>
chip_gen: v5e
topology: v5e:2x2
jax: 0.10.0
libtpu: 0.0.40
codegen_flags: <defaults>
</compile_context>

<pallas_src>
import functools
import math

import jax
import jax.numpy as jnp
from jax.experimental import pallas as pl
from jax.experimental.pallas import tpu as pltpu


def _round_up(a, m):
    return (a + m - 1) // m * m


def _round_down(a, m):
    return (a // m) * m


def _add_pe_kernel(x_ref, pe_ref, o_ref, *, batch):
    # x_ref: (TS, B*D), pe_ref: (TS, D), o_ref: (TS, B*D).
    # Replicate the pe rows B times along the lane dim, then add on the VPU.
    pe_rep = jnp.tile(pe_ref[...], (1, batch))
    o_ref[...] = (x_ref[...] + pe_rep).astype(o_ref.dtype)


def make_positional_encoding(d_model, max_len=5000, dtype=jnp.float32):
    """Builds the pe buffer exactly as the PyTorch module: [max_len, 1, d_model]."""
    position = jnp.arange(max_len, dtype=jnp.float32)[:, None]              # [L, 1]
    div_term = jnp.exp(
        jnp.arange(0, d_model, 2, dtype=jnp.float32) * (-math.log(10000.0) / d_model)
    )                                                                       # [D/2]
    angles = position * div_term                                            # [L, D/2]
    pe = jnp.zeros((max_len, d_model), jnp.float32)
    pe = pe.at[:, 0::2].set(jnp.sin(angles))
    pe = pe.at[:, 1::2].set(jnp.cos(angles))
    return pe[:, None, :].astype(dtype)                                     # [L, 1, D]


def positional_encoding_forward(x, pe, *, tile_s=None, vmem_block_bytes=None,
                                donate_x=False):
    """Pallas equivalent of PositionalEncoding.forward (eval mode).

    x:  [S, B, D]
    pe: [max_len, 1, D] (or [max_len, D]) with max_len >= S
    returns [S, B, D]
    """
    S, B, D = x.shape
    BD = B * D

    # Free metadata reshapes on contiguous arrays: lane-dense 2D slabs.
    x2 = x.reshape(S, BD)                                  # [S, B*D]
    pe2 = pe.reshape(pe.shape[0], pe.shape[-1])            # [max_len, D]
    assert pe2.shape[0] >= S and pe2.shape[1] == D

    x_itemsize = jnp.dtype(x.dtype).itemsize
    pe_itemsize = jnp.dtype(pe2.dtype).itemsize
    # Sublane multiple for this dtype (f32: 8, bf16: 16, int8/fp8: 32).
    sublane = max(8, 32 // x_itemsize)

    # Generation-aware VMEM budget (v7x has only 64 MiB physical per TC).
    try:
        vmem_cap = int(pltpu.get_tpu_info().vmem_capacity_bytes)
    except Exception:
        vmem_cap = 64 << 20  # conservative (v7x) fallback

    if vmem_block_bytes is None:
        vmem_block_bytes = min(4 << 20, vmem_cap // 16)

    # Padded (lane-aligned) bytes per sequence row — this is the real VMEM cost.
    x_row_bytes = _round_up(BD, 128) * x_itemsize
    pe_row_bytes = _round_up(D, 128) * pe_itemsize

    if tile_s is None:
        ts = max(sublane, vmem_block_bytes // max(1, x_row_bytes))
    else:
        ts = int(tile_s)
    # Guarantee >= 2 grid steps so the "parallel" axis feeds both v7x
    # TensorCores (no-op on single-core v5e/v6e).
    if S > sublane:
        half = max(sublane, _round_down(pl.cdiv(S, 2), sublane))
        ts = min(ts, half)
    ts = min(ts, S)
    if ts > sublane:
        ts = _round_down(ts, sublane)
    TS = max(1, ts)
    grid = (pl.cdiv(S, TS),)

    # Double-buffered working set: 2 x (x_in + out) + 2 x pe, plus headroom.
    work_bytes = 2 * (2 * TS * x_row_bytes + TS * pe_row_bytes)
    vmem_limit = int(min(vmem_cap // 2, max(32 << 20, work_bytes + (8 << 20))))

    kernel = functools.partial(_add_pe_kernel, batch=B)

    out2 = pl.pallas_call(
        kernel,
        out_shape=jax.ShapeDtypeStruct((S, BD), x.dtype),
        grid_spec=pltpu.PrefetchScalarGridSpec(
            num_scalar_prefetch=0,
            grid=grid,
            in_specs=[
                # Lane-dense x tile: last dim is the full B*D (multiple of 128
                # in typical configs; full-extent otherwise).
                pl.BlockSpec((TS, BD), lambda i: (i, 0)),
                # Matching pe rows, un-broadcast in HBM; full pe buffer is
                # passed — only the first cdiv(S, TS) blocks are ever touched.
                pl.BlockSpec((TS, D), lambda i: (i, 0)),
            ],
            out_specs=pl.BlockSpec((TS, BD), lambda i: (i, 0)),
        ),
        compiler_params=pltpu.CompilerParams(
            # Independent row tiles -> shard across TensorCores on v7x.
            dimension_semantics=("parallel",),
            vmem_limit_bytes=vmem_limit,
        ),
        cost_estimate=pl.CostEstimate(
            flops=S * BD,
            transcendentals=0,
            bytes_accessed=x_itemsize * 2 * S * BD + pe_itemsize * S * D,
        ),
        # In-place add when the caller no longer needs x (removes the output
        # allocation; HBM traffic is unchanged).
        input_output_aliases=({0: 0} if donate_x else {}),
    )(x2, pe2)

    # TODO(synk): training-mode dropout (p=0.1) is not applied; this matches
    # module.eval() forward semantics where nn.Dropout is the identity.
    return out2.reshape(S, B, D)


if __name__ == "__main__":
    # Small shapes consistent with the module's forward: x is [seq, batch, d_model].
    SEQ = 64
    BATCH = 4
    D_MODEL = 32
    MAX_LEN = 5000  # module default

    key = jax.random.PRNGKey(0)
    x = jax.random.normal(key, (SEQ, BATCH, D_MODEL), jnp.float32)

    pe = make_positional_encoding(D_MODEL, MAX_LEN)

    # tile_s=16 -> grid=(4,), exercising the multi-step, double-buffered path
    # even at these small test shapes.
    y = positional_encoding_forward(x, pe, tile_s=16)
    y = jax.block_until_ready(y)

    # Reference check in plain JAX (eval-mode forward: dropout is identity).
    y_ref = x + pe[:SEQ]
    assert y.shape == (SEQ, BATCH, D_MODEL), y.shape
    assert jnp.allclose(y, y_ref, atol=1e-6, rtol=1e-6), "mismatch vs reference"

    print("KERNEL_OK")
</pallas_src>

<mosaic_0001>
module attributes {stable_mosaic.version = 11 : i64} {
  func.func @_add_pe_kernel(%arg0: i32, %arg1: memref<16x128xf32, #tpu.memory_space<vmem>>, %arg2: memref<16x32xf32, #tpu.memory_space<vmem>>, %arg3: memref<16x128xf32, #tpu.memory_space<vmem>>) attributes {dimension_semantics = [#tpu.dimension_semantics<parallel>], iteration_bounds = array<i64: 4>, scalar_prefetch = 0 : i64, scratch_operands = 0 : i64, tpu.core_type = #tpu.core_type<tc>, window_params = [{transform_indices = @transform_0, window_bounds = array<i64: 16, 128>}, {transform_indices = @transform_1, window_bounds = array<i64: 16, 32>}, {transform_indices = @transform_2, window_bounds = array<i64: 16, 128>}]} {
    %c0 = arith.constant 0 : index
    %c0_0 = arith.constant 0 : index
    %0 = vector.load %arg2[%c0, %c0_0] : memref<16x32xf32, #tpu.memory_space<vmem>>, vector<16x32xf32>
    %1 = tpu.concatenate %0, %0, %0, %0 in 1 : vector<16x32xf32>, vector<16x32xf32>, vector<16x32xf32>, vector<16x32xf32> -> vector<16x128xf32>
    %c0_1 = arith.constant 0 : index
    %c0_2 = arith.constant 0 : index
    %2 = vector.load %arg1[%c0_1, %c0_2] : memref<16x128xf32, #tpu.memory_space<vmem>>, vector<16x128xf32>
    %3 = arith.addf %2, %1 : vector<16x128xf32>
    %c0_3 = arith.constant 0 : index
    %c0_4 = arith.constant 0 : index
    %4 = vector.load %arg3[%c0_3, %c0_4] : memref<16x128xf32, #tpu.memory_space<vmem>>, vector<16x128xf32>
    tpu.vector_store %arg3[%c0_3, %c0_4], %3 {strides = array<i32>} : memref<16x128xf32, #tpu.memory_space<vmem>>, vector<16x128xf32>,
    return
  }
  func.func @transform_0(%arg0: i32) -> (i32, i32) {
    %c0_i32 = arith.constant 0 : i32
    %c0_i32_0 = arith.constant 0 : i32
    return %arg0, %c0_i32 : i32, i32
  }
  func.func @transform_1(%arg0: i32) -> (i32, i32) {
    %c0_i32 = arith.constant 0 : i32
    %c0_i32_0 = arith.constant 0 : i32
    return %arg0, %c0_i32 : i32, i32
  }
  func.func @transform_2(%arg0: i32) -> (i32, i32) {
    %c0_i32 = arith.constant 0 : i32
    %c0_i32_0 = arith.constant 0 : i32
    return %arg0, %c0_i32 : i32, i32
  }
}

</mosaic_0001>

<bundles_post_ra>
// kernel: tpu_custom_call.1
= control target key start
LH: loop header
LB: loop body
LE: loop exit
PB: predicated region body
PF: predicated region fallthrough
CT: control target
= control target key end

     0   :  { %7 = vsyncpa [#allocation3], 0  ;;  %s554_s0 = inlined_call_operand.vmem [shape: f32[64,128], index: 0, kind: input, shape index: {}]   ;;  %s555_s1 = inlined_call_operand.vmem [shape: f32[5000,32], index: 1, kind: input, shape index: {}]   ;;  %s556_s2 = inlined_call_operand.hbm [shape: f32[64,128], index: 2, kind: output, shape index: {}]  }
   0x1   :  { %9 = vsyncpa [#allocation3 + $0x1], 0  ;;  %s457_s9 = smov 0   ;;  %s459_s10 = smov 0  }
   0x2   :  { %s461_s11 = smov 0   ;;  %s463_s12 = smov 0  }
   0x3 LB: > { %s478_s13 = sadd.s32 4294967295, %s435_s12   ;;  %s314_s14 = sadd.s32 4294967294, %s435_s12   ;;  %s435_s12 = sphi %s463_s12, %s562_s12   ;;  %s431_s11 = sphi %s461_s11, %s561_s11   ;;  %s427_s10 = sphi %s459_s10, %s560_s10   ;;  %s423_s9 = sphi %s457_s9, %s559_s9  }
   0x4   : > { %s482_s15 = sadd.s32 1, %s435_s12   ;;  %s74_s16 = sadd.s32 1, %s431_s11 }
   0x5   : > { %s71_s17 = ssub.s32 %s435_s12, %s482_s15  ;;  %p84_p0 = scmp.ne.s32.totalorder %s431_s11, %s427_s10 }
   0x6   : > { %p72_p1 = scmp.eq.s32.totalorder %s71_s17, 0  ;;  %p85_p2 = scmp.eq.s32.totalorder %s478_s13, 3 }
   0x7   : > { %p90_p3 = scmp.ne.s32.totalorder %s427_s10, %s423_s9  ;;  %p91_p4 = scmp.eq.s32.totalorder %s314_s14, 3 }
   0x8   : > { %s493_s18 = scalar_select %p72_p1, %s431_s11, %s74_s16  }
   0x9   : > { %p495_p5 = por %p85_p2, %p84_p0  ;;  %p499_p6 = por %p91_p4, %p90_p3 }
   0xa   : > { %p317_p7 = scmp.ge.s32.totalorder %s435_s12, 1  ;;  %p135_p8 = scmp.lt.s32.totalorder %s435_s12, 5 }
   0xc   : > { %p136_p9 = pnand %p317_p7, %p135_p8 }
   0xd   : > { %s319_s21 = sshll.u32 (!%p136_p9), %s478_s13, 1  ;;  %s437_s27 = smov (!%p136_p9), 32  }
   0xe   : > { %139 = sbr.rel (%p136_p9) target bundleno = 156 (0x9c), region = 28  ;;  %p177_p10 = scmp.lt.s32.totalorder (!%p136_p9), %s319_s21, 624 }
   0xf   : > { %s438_s28 = smov (!%p136_p9), 64   ;;  %s439_s29 = smov (!%p136_p9), 96  }
  0x10   : > { %p167_p11 = scmp.lt.s32.totalorder (!%p136_p9), %s319_s21, 7  ;;  %s163_s3 = sand.u32 (!%p136_p9), 1, %s427_s10  }
  0x11   : > { %s318_s7 = sshll.u32 (!%p136_p9), %s163_s3, 4  ;;  %s328_s8 = sshll.u32 (!%p136_p9), %s478_s13, 4 }
  0x12   : > { %s165_s14 = scalar_lea.vmem (!%p136_p9), [#allocation2], %s318_s7  ;;  %s225_s13 = scalar_lea.sflag (!%p136_p9), [#allocation3], %s163_s3 }
  0x13   : > { %s178_s22 = scalar_select %p177_p10, %s319_s21, 624  ;;  %vm209_vm0 = vcmask 261120   ;;  %vm212_vm1 = vcmask 523264   ;;  %vm215_vm2 = vcmask 785408  }
  0x14   : > { %s564_s21 = smov (!%p167_p11, %s319_s21), 7 }
  0x15   : > { %s322_s23 = sshll.u32 %s178_s22, 3  ;;  %s320_s30 = sshll.u32 %s564_s21, 3 }
  0x16   : > { %s180_s26 = scalar_lea.vmem %s555_s1, %s322_s23  ;;  %s170_s6 = scalar_lea.vmem %s554_s0, %s320_s30 }
  0x17   : > { %v187_v0 = vld [vmem:[%s180_s26] sm:$0xff]  ;;  %v188_v1 = vld [vmem:[%s180_s26 + $0x8] sm:$0xff]  ;;  %s236_s21 = scalar_lea.hbm %s556_s2, %s328_s8  ;;  %s237_s22 = sshll.u32 %s165_s14, 4  ;;  %s238_s22 = int_to_ptr.vmem [resolvable:$true] %s237_s22 }
  0x18   : > { %191 = vrot.lane.b32.xlu0 %v187_v0, %s437_s27  ;;  %197 = vrot.lane.b32.xlu1 %v187_v0, %s438_s28  ;;  %v218_v6 = vld [vmem:[%s170_s6] sm:$0xff]  ;;  %v219_v14 = vld [vmem:[%s170_s6 + $0x8] sm:$0xff]  ;;  %s239_s23 = sshll.u32 %s236_s21, 4  ;;  %s240_s23 = int_to_ptr.hbm [resolvable:$true] %s239_s23 }
  0x19   : > { %203 = vrot.lane.b32.xlu2 %v187_v0, %s439_s29  ;;  %s387_s24 = sshra.s32 %s240_s23, 4  ;;  %s388_s24 = int_to_ptr.hbm [resolvable:$true] %s387_s24 }
  0x1a   : > { %s389_s25 = scalar_lea.hbm %s388_s24, 16  ;;  %p394_p1 = scmp.lt.s32.totalorder %s388_s24, %s556_s2 }
  0x1b   : > { %p390_p12 = scmp.ne.s32.totalorder %s388_s24, %s389_s25 }
  0x1d   : > { %p391_p13 = pnand %p390_p12, %p495_p5 }
  0x1f   : > { %p392_p0 = pneg %p391_p13 }
  0x20   : > { %193 = vrot.lane.b32.xlu0 %v188_v1, %s437_s27  ;;  %199 = vrot.lane.b32.xlu1 %v188_v1, %s438_s28  ;;  %s393_s28 = scalar_lea.hbm %s556_s2, 64 }
  0x21   : > { %205 = vrot.lane.b32.xlu2 %v188_v1, %s439_s29  ;;  %p395_p2 = scmp.lt.s32.totalorder %s393_s28, %s389_s25 }
  0x23   : > { %p396_p3 = por %p395_p2, %p394_p1 }
  0x25   : > { %p397_p4 = pnand %p396_p3, %p392_p0 }
  0x73   : > { %v204_v2 = vpop.permute.xlu2 %203 }
  0x7b   : > { %v206_v10 = vpop.permute.xlu2 %205 }
  0x8a   : > { %v192_v3 = vpop.permute.xlu0 %191  ;;  %v198_v4 = vpop.permute.xlu1 %197 }
  0x8b   : > { %v210_v5 = vsel %vm209_vm0, %v187_v0, %v192_v3 }
  0x8c   : > { %v213_v7 = vsel %vm212_vm1, %v210_v5, %v198_v4 }
  0x8d   : > { %v216_v8 = vsel %vm215_vm2, %v213_v7, %v204_v2 }
  0x8e   : > { %v220_v9 = vadd.f32 %v218_v6, %v216_v8 }
  0x90   : > { %222 = vst [vmem:[%s165_s14] sm:$0xff] %v220_v9 }
  0x92   : > { %v194_v11 = vpop.permute.xlu0 %193  ;;  %v200_v12 = vpop.permute.xlu1 %199 }
  0x93   : > { %v211_v13 = vsel %vm209_vm0, %v188_v1, %v194_v11 }
  0x94   : > { %v214_v15 = vsel %vm212_vm1, %v211_v13, %v200_v12 }
  0x95   : > { %v217_v16 = vsel %vm215_vm2, %v214_v15, %v206_v10 }
  0x96   : > { %v221_v17 = vadd.f32 %v219_v14, %v217_v16 }
  0x98   : > { %223 = vst [vmem:[%s165_s14 + $0x8] sm:$0xff] %v221_v17 }
  0x99   : > { %400 = shalt.err (!%p397_p4)
}
  0x9a   : > { %s440_s3 = smov 128   ;;  %s441_s4 = smov 8  }
  0x9b   : > { %329 = dma.vmem_to_hbm [thread:$0]  (%p495_p5), %s238_s22, 256, %s240_s23, %s225_s13, %s440_s3, %s440_s3, %s441_s4  }
  0x9c PF: > { %p335_p7 = scmp.ge.s32.totalorder %s435_s12, 2  ;;  %s254_s5 = sand.u32 1, %s423_s9  }
  0x9d   : > { %s255_s6 = scalar_lea.sflag [#allocation3], %s254_s5 }
  0x9e   : > { %p332_p8 = pnand %p335_p7, %p499_p6 }
  0xa0   : > { %p333_p9 = pneg %p332_p8 }
  0xa2   : > { %418 = dma.done.wait (%p333_p9), %s255_s6, 256  }
  0xa3   : > { %420 = vsyncadd (%p333_p9), %s255_s6, 4294967040  ;;  %p12_p10 = scmp.ge.s32.totalorder %s482_s15, 6   ;;  %s559_s9 = smov %s427_s10 }
  0xa4   : > { %s560_s10 = smov %s431_s11  ;;  %s561_s11 = smov %s493_s18 }
  0xa5   : > { %s562_s12 = smov %s482_s15  ;;  %14 = sbr.rel (!%p12_p10) target bundleno = 3 (0x3), region = 66 }
  0xaa   :  { %261 = vsyncpa [#allocation3], 1 }
  0xab   :  { %263 = vsyncpa [#allocation3 + $0x1], 1 }

</bundles_post_ra>
